<compile_context>
chip_gen: v7x
topology: tpu7x:2x2x1
jax: 0.10.0
libtpu: 0.0.40
codegen_flags: <defaults>
</compile_context>

<pallas_src>
import math

import jax
import jax.numpy as jnp
from jax.experimental import pallas as pl
from jax.experimental.pallas import tpu as pltpu


# ----------------------------- Pallas kernel -------------------------------

def _leaky_relu(x, slope=0.2):
    return jnp.where(x > 0, x, slope * x)


def _discriminator_kernel(x_ref, w1_ref, b1_ref, w2_ref, b2_ref, w3_ref, b3_ref,
                          o_ref):
    """Fully fused MLP: (Linear + LeakyReLU) x2 + final Linear."""
    x = x_ref[...]

    # Layer 1: Linear(D -> 2D//3) + LeakyReLU(0.2). MXU accumulates in f32.
    h = jnp.dot(x, w1_ref[...], preferred_element_type=jnp.float32)
    h = _leaky_relu(h + b1_ref[...].astype(jnp.float32))

    # Layer 2: Linear(2D//3 -> D//3) + LeakyReLU(0.2).
    h = jnp.dot(h.astype(w2_ref.dtype), w2_ref[...],
                preferred_element_type=jnp.float32)
    h = _leaky_relu(h + b2_ref[...].astype(jnp.float32))

    # Layer 3: Linear(D//3 -> 1).
    y = jnp.dot(h.astype(w3_ref.dtype), w3_ref[...],
                preferred_element_type=jnp.float32)
    y = y + b3_ref[...].astype(jnp.float32)

    o_ref[...] = y.astype(o_ref.dtype)


# ------------------------------- Wrapper ------------------------------------

def discriminator_forward(params, x, *, tile_b=None):
    """x: (batch, input_dim) -> (batch, 1). Single fused pallas_call."""
    batch, in_dim = x.shape
    w1, b1 = params["w1"], params["b1"]
    w2, b2 = params["w2"], params["b2"]
    w3, b3 = params["w3"], params["b3"]

    h1 = w1.shape[1]
    h2 = w2.shape[1]
    out_dim = w3.shape[1]

    # Pick a batch tile: multiple of 8 (f32 sublane group) that divides batch.
    if tile_b is None:
        tile_b = min(batch, 256)
    while batch % tile_b != 0:
        tile_b //= 2
    tile_b = max(tile_b, 1)

    grid = (batch // tile_b,)

    # Activations are tiled over the batch; weights/biases use a constant
    # index_map so the same (whole) VMEM-resident copy is reused every step.
    def _const(i):
        return (0, 0)

    in_specs = [
        pl.BlockSpec((tile_b, in_dim), lambda i: (i, 0)),   # x tile
        pl.BlockSpec((in_dim, h1), _const),                 # w1
        pl.BlockSpec((1, h1), _const),                      # b1
        pl.BlockSpec((h1, h2), _const),                     # w2
        pl.BlockSpec((1, h2), _const),                      # b2
        pl.BlockSpec((h2, out_dim), _const),                # w3
        pl.BlockSpec((1, out_dim), _const),                 # b3
    ]
    out_specs = pl.BlockSpec((tile_b, out_dim), lambda i: (i, 0))

    return pl.pallas_call(
        _discriminator_kernel,
        out_shape=jax.ShapeDtypeStruct((batch, out_dim), x.dtype),
        grid_spec=pltpu.PrefetchScalarGridSpec(
            num_scalar_prefetch=0,
            grid=grid,
            in_specs=in_specs,
            out_specs=out_specs,
        ),
        compiler_params=pltpu.CompilerParams(
            dimension_semantics=("parallel",),
        ),
    )(x, w1, b1, w2, b2, w3, b3)


# ------------------------- Parameter construction ---------------------------

def _make_linear_params(key, fan_in, fan_out, dtype=jnp.float32):
    """PyTorch-style uniform(-1/sqrt(fan_in), 1/sqrt(fan_in)) init."""
    kw, kb = jax.random.split(key)
    bound = 1.0 / math.sqrt(fan_in)
    w = jax.random.uniform(kw, (fan_in, fan_out), dtype, -bound, bound)
    b = jax.random.uniform(kb, (1, fan_out), dtype, -bound, bound)
    return w, b


def init_discriminator_params(key, input_dim, dtype=jnp.float32):
    h1 = 2 * input_dim // 3
    h2 = input_dim // 3
    k1, k2, k3 = jax.random.split(key, 3)
    w1, b1 = _make_linear_params(k1, input_dim, h1, dtype)
    w2, b2 = _make_linear_params(k2, h1, h2, dtype)
    w3, b3 = _make_linear_params(k3, h2, 1, dtype)
    return dict(w1=w1, b1=b1, w2=w2, b2=b2, w3=w3, b3=b3)


# -------------------------- Pure-JAX reference ------------------------------

def _reference_forward(params, x):
    h = x @ params["w1"] + params["b1"]
    h = jnp.where(h > 0, h, 0.2 * h)
    h = h @ params["w2"] + params["b2"]
    h = jnp.where(h > 0, h, 0.2 * h)
    return h @ params["w3"] + params["b3"]


# --------------------------------- Main --------------------------------------

if __name__ == "__main__":
    input_dim = 96          # -> hidden dims 64 and 32, output dim 1
    batch = 64              # tiled over the grid (tile_b=32)

    key = jax.random.PRNGKey(0)
    k_params, k_x = jax.random.split(key)

    params = init_discriminator_params(k_params, input_dim)
    x = jax.random.normal(k_x, (batch, input_dim), jnp.float32)

    out = discriminator_forward(params, x, tile_b=32)
    out = jax.block_until_ready(out)

    assert out.shape == (batch, 1), out.shape
    assert bool(jnp.all(jnp.isfinite(out)))

    ref = _reference_forward(params, x)
    assert bool(jnp.allclose(out, ref, atol=1e-5, rtol=1e-5)), (
        float(jnp.max(jnp.abs(out - ref))))

    print("KERNEL_OK")
</pallas_src>

<mosaic_0001>
module attributes {stable_mosaic.version = 11 : i64} {
  func.func @_discriminator_kernel(%arg0: i32, %arg1: memref<32x96xf32, #tpu.memory_space<vmem>>, %arg2: memref<96x64xf32, #tpu.memory_space<vmem>>, %arg3: memref<1x64xf32, #tpu.memory_space<vmem>>, %arg4: memref<64x32xf32, #tpu.memory_space<vmem>>, %arg5: memref<1x32xf32, #tpu.memory_space<vmem>>, %arg6: memref<32x1xf32, #tpu.memory_space<vmem>>, %arg7: memref<1x1xf32, #tpu.memory_space<vmem>>, %arg8: memref<32x1xf32, #tpu.memory_space<vmem>>) attributes {dimension_semantics = [#tpu.dimension_semantics<parallel>], iteration_bounds = array<i64: 2>, scalar_prefetch = 0 : i64, scratch_operands = 0 : i64, tpu.core_type = #tpu.core_type<tc>, window_params = [{transform_indices = @transform_0, window_bounds = array<i64: 32, 96>}, {pipeline_mode = #tpu.pipeline_mode<synchronous>, transform_indices = @transform_1, window_bounds = array<i64: 96, 64>}, {pipeline_mode = #tpu.pipeline_mode<synchronous>, transform_indices = @transform_2, window_bounds = array<i64: 1, 64>}, {pipeline_mode = #tpu.pipeline_mode<synchronous>, transform_indices = @transform_3, window_bounds = array<i64: 64, 32>}, {pipeline_mode = #tpu.pipeline_mode<synchronous>, transform_indices = @transform_4, window_bounds = array<i64: 1, 32>}, {pipeline_mode = #tpu.pipeline_mode<synchronous>, transform_indices = @transform_5, window_bounds = array<i64: 32, 1>}, {pipeline_mode = #tpu.pipeline_mode<synchronous>, transform_indices = @transform_6, window_bounds = array<i64: 1, 1>}, {transform_indices = @transform_7, window_bounds = array<i64: 32, 1>}]} {
    %c0 = arith.constant 0 : index
    %c0_0 = arith.constant 0 : index
    %0 = vector.load %arg1[%c0, %c0_0] : memref<32x96xf32, #tpu.memory_space<vmem>>, vector<32x96xf32>
    %c0_1 = arith.constant 0 : index
    %c0_2 = arith.constant 0 : index
    %1 = vector.load %arg2[%c0_1, %c0_2] : memref<96x64xf32, #tpu.memory_space<vmem>>, vector<96x64xf32>
    %cst = arith.constant dense<0.000000e+00> : vector<32x64xf32>
    %2 = tpu.matmul %0, %1, %cst {dimension_numbers = #tpu.dot_dimension_numbers<[1], [0], [0], [1], [0, 0, 1, 1], [], []>} : vector<32x96xf32>, vector<96x64xf32>, vector<32x64xf32> -> vector<32x64xf32>
    %c0_3 = arith.constant 0 : index
    %c0_4 = arith.constant 0 : index
    %3 = vector.load %arg3[%c0_3, %c0_4] : memref<1x64xf32, #tpu.memory_space<vmem>>, vector<1x64xf32>
    %4 = vector.broadcast %3 : vector<1x64xf32> to vector<32x64xf32>
    %5 = arith.addf %2, %4 : vector<32x64xf32>
    %cst_5 = arith.constant 0.000000e+00 : f32
    %6 = vector.broadcast %cst_5 : f32 to vector<32x64xf32>
    %7 = arith.cmpf ogt, %5, %6 : vector<32x64xf32>
    %cst_6 = arith.constant 2.000000e-01 : f32
    %8 = vector.broadcast %cst_6 : f32 to vector<32x64xf32>
    %9 = arith.mulf %8, %5 : vector<32x64xf32>
    %10 = arith.select %7, %5, %9 : vector<32x64xi1>, vector<32x64xf32>
    %c0_7 = arith.constant 0 : index
    %c0_8 = arith.constant 0 : index
    %11 = vector.load %arg4[%c0_7, %c0_8] : memref<64x32xf32, #tpu.memory_space<vmem>>, vector<64x32xf32>
    %cst_9 = arith.constant dense<0.000000e+00> : vector<32x32xf32>
    %12 = tpu.matmul %10, %11, %cst_9 {dimension_numbers = #tpu.dot_dimension_numbers<[1], [0], [0], [1], [0, 0, 1, 1], [], []>} : vector<32x64xf32>, vector<64x32xf32>, vector<32x32xf32> -> vector<32x32xf32>
    %c0_10 = arith.constant 0 : index
    %c0_11 = arith.constant 0 : index
    %13 = vector.load %arg5[%c0_10, %c0_11] : memref<1x32xf32, #tpu.memory_space<vmem>>, vector<1x32xf32>
    %14 = vector.broadcast %13 : vector<1x32xf32> to vector<32x32xf32>
    %15 = arith.addf %12, %14 : vector<32x32xf32>
    %cst_12 = arith.constant 0.000000e+00 : f32
    %16 = vector.broadcast %cst_12 : f32 to vector<32x32xf32>
    %17 = arith.cmpf ogt, %15, %16 : vector<32x32xf32>
    %cst_13 = arith.constant 2.000000e-01 : f32
    %18 = vector.broadcast %cst_13 : f32 to vector<32x32xf32>
    %19 = arith.mulf %18, %15 : vector<32x32xf32>
    %20 = arith.select %17, %15, %19 : vector<32x32xi1>, vector<32x32xf32>
    %c0_14 = arith.constant 0 : index
    %c0_15 = arith.constant 0 : index
    %21 = vector.load %arg6[%c0_14, %c0_15] : memref<32x1xf32, #tpu.memory_space<vmem>>, vector<32x1xf32>
    %cst_16 = arith.constant dense<0.000000e+00> : vector<32x1xf32>
    %22 = tpu.matmul %20, %21, %cst_16 {dimension_numbers = #tpu.dot_dimension_numbers<[1], [0], [0], [1], [0, 0, 1, 1], [], []>} : vector<32x32xf32>, vector<32x1xf32>, vector<32x1xf32> -> vector<32x1xf32>
    %c0_17 = arith.constant 0 : index
    %c0_18 = arith.constant 0 : index
    %23 = vector.load %arg7[%c0_17, %c0_18] : memref<1x1xf32, #tpu.memory_space<vmem>>, vector<1x1xf32>
    %24 = vector.broadcast %23 : vector<1x1xf32> to vector<32x1xf32>
    %25 = arith.addf %22, %24 : vector<32x1xf32>
    %c0_19 = arith.constant 0 : index
    %c0_20 = arith.constant 0 : index
    %26 = vector.load %arg8[%c0_19, %c0_20] : memref<32x1xf32, #tpu.memory_space<vmem>>, vector<32x1xf32>
    tpu.vector_store %arg8[%c0_19, %c0_20], %25 {strides = array<i32>} : memref<32x1xf32, #tpu.memory_space<vmem>>, vector<32x1xf32>,
    return
  }
  func.func @transform_0(%arg0: i32) -> (i32, i32) {
    %c0_i32 = arith.constant 0 : i32
    %c0_i32_0 = arith.constant 0 : i32
    return %arg0, %c0_i32 : i32, i32
  }
  func.func @transform_1(%arg0: i32) -> (i32, i32) {
    %c0_i32 = arith.constant 0 : i32
    %c0_i32_0 = arith.constant 0 : i32
    %c0_i32_1 = arith.constant 0 : i32
    return %c0_i32, %c0_i32_0 : i32, i32
  }
  func.func @transform_2(%arg0: i32) -> (i32, i32) {
    %c0_i32 = arith.constant 0 : i32
    %c0_i32_0 = arith.constant 0 : i32
    %c0_i32_1 = arith.constant 0 : i32
    return %c0_i32, %c0_i32_0 : i32, i32
  }
  func.func @transform_3(%arg0: i32) -> (i32, i32) {
    %c0_i32 = arith.constant 0 : i32
    %c0_i32_0 = arith.constant 0 : i32
    %c0_i32_1 = arith.constant 0 : i32
    return %c0_i32, %c0_i32_0 : i32, i32
  }
  func.func @transform_4(%arg0: i32) -> (i32, i32) {
    %c0_i32 = arith.constant 0 : i32
    %c0_i32_0 = arith.constant 0 : i32
    %c0_i32_1 = arith.constant 0 : i32
    return %c0_i32, %c0_i32_0 : i32, i32
  }
  func.func @transform_5(%arg0: i32) -> (i32, i32) {
    %c0_i32 = arith.constant 0 : i32
    %c0_i32_0 = arith.constant 0 : i32
    %c0_i32_1 = arith.constant 0 : i32
    return %c0_i32, %c0_i32_0 : i32, i32
  }
  func.func @transform_6(%arg0: i32) -> (i32, i32) {
    %c0_i32 = arith.constant 0 : i32
    %c0_i32_0 = arith.constant 0 : i32
    %c0_i32_1 = arith.constant 0 : i32
    return %c0_i32, %c0_i32_0 : i32, i32
  }
  func.func @transform_7(%arg0: i32) -> (i32, i32) {
    %c0_i32 = arith.constant 0 : i32
    %c0_i32_0 = arith.constant 0 : i32
    return %arg0, %c0_i32 : i32, i32
  }
}

</mosaic_0001>

<bundles_post_ra>
// kernel: tpu_custom_call.1
= control target key start
LH: loop header
LB: loop body
LE: loop exit
PB: predicated region body
PF: predicated region fallthrough
CT: control target
= control target key end

     0   :  { %s947_s26 = smov 0   ;;  %s1057_s0 = inlined_call_operand.vmem [shape: f32[64,96], index: 0, kind: input, shape index: {}]   ;;  %s1058_s1 = inlined_call_operand.vmem [shape: f32[96,64], index: 1, kind: input, shape index: {}]   ;;  %s1059_s2 = inlined_call_operand.vmem [shape: f32[1,64], index: 2, kind: input, shape index: {}]   ;;  %s1060_s3 = inlined_call_operand.vmem [shape: f32[64,32], index: 3, kind: input, shape index: {}]   ;;  %s1061_s4 = inlined_call_operand.vmem [shape: f32[1,32], index: 4, kind: input, shape index: {}]   ;;  %s1062_s5 = inlined_call_operand.vmem [shape: f32[32,1], index: 5, kind: input, shape index: {}]   ;;  %s1063_s6 = inlined_call_operand.<no memory space> [shape: f32[1,1], index: 6, kind: input, shape index: {}]   ;;  %s1064_s7 = inlined_call_operand.vmem [shape: f32[64,1], index: 7, kind: output, shape index: {}]  }
   0x1   :  { %v12_v0 = vstv %s1063_s6 }
   0x2   :  { %13 = vst [vmem:[#allocation2] sm:$0x1] %v12_v0 }
   0x3 LB: > { %s712_s27 = sadd.s32 4294967295, %s902_s26   ;;  %p716_p0 = scmp.ge.s32.totalorder %s902_s26, 1  ;;  %s902_s26 = sphi %s947_s26, %s19_s26  }
   0x4   : > { %p240_p1 = scmp.lt.s32.totalorder %s902_s26, 3 }
   0x6   : > { %p241_p2 = pnand %p716_p0, %p240_p1 }
   0x7   : > { %v288_v1 = vld [vmem:[%s1058_s1] sm:$0xff] (!%p241_p2)  ;;  %v289_v2 = vld [vmem:[%s1058_s1 + $0x8] sm:$0xff] (!%p241_p2)  ;;  %v290_v3 = vld [vmem:[%s1058_s1 + $0x10] sm:$0xff] (!%p241_p2)  ;;  %s717_s10 = sshll.u32 (!%p241_p2), %s712_s27, 2  ;;  %vm307_vm0 = vcmask (!%p241_p2), 785408   ;;  %vm432_vm3 = vcmask (!%p241_p2), 523264  }
   0x8   : > { %244 = sbr.rel (%p241_p2) target bundleno = 692 (0x2b4), region = 48  ;;  %v840_v4 = vpack.c.bf16 (!%p241_p2), %v289_v2, %v288_v1  ;;  %v291_v5 = vld [vmem:[%s1058_s1 + $0x18] sm:$0xff] (!%p241_p2)  ;;  %p273_p3 = scmp.lt.s32.totalorder (!%p241_p2), %s717_s10, 7  ;;  %v292_v7 = vld [vmem:[%s1058_s1 + $0x20] sm:$0xff] (!%p241_p2)  ;;  %v293_v8 = vld [vmem:[%s1058_s1 + $0x28] sm:$0xff] (!%p241_p2)  ;;  %vm553_vm8 = vcmask (!%p241_p2), 261120  }
   0x9   : > { %v844_v6 = vpack.c.bf16 (!%p241_p2), %v291_v5, %v290_v3  ;;  %v417_v9 = vld [vmem:[%s1060_s3] sm:$0xff] (!%p241_p2)  ;;  %v418_v10 = vld [vmem:[%s1060_s3 + $0x8] sm:$0xff] (!%p241_p2)  ;;  %v419_v11 = vld [vmem:[%s1060_s3 + $0x10] sm:$0xff] (!%p241_p2)  ;;  %v848_v12 = vpack.c.bf16 (!%p241_p2), %v293_v8, %v292_v7  ;;  %vm651_vm11 = vcmask (!%p241_p2), 7168  }
   0xa   : > { %841 = vmatprep.subr.bf16.mxu0 (!%p241_p2), %v840_v4  ;;  %v864_v13 = vpack.c.bf16 (!%p241_p2), %v418_v10, %v417_v9  ;;  %v420_v14 = vld [vmem:[%s1060_s3 + $0x18] sm:$0xff] (!%p241_p2)  ;;  %v294_v15 = vld [vmem:[%s1058_s1 + $0x30] sm:$0xff] (!%p241_p2)  ;;  %v296_v20 = vld [vmem:[%s1058_s1 + $0x40] sm:$0xff] (!%p241_p2) }
   0xb   : > { %843 = vmatpush3.bf16.msra.mxu0 (!%p241_p2), %v840_v4  ;;  %v295_v16 = vld [vmem:[%s1058_s1 + $0x38] sm:$0xff] (!%p241_p2)  ;;  %v868_v17 = vpack.c.bf16 (!%p241_p2), %v420_v14, %v419_v11  ;;  %v297_v21 = vld [vmem:[%s1058_s1 + $0x48] sm:$0xff] (!%p241_p2)  ;;  %v298_v23 = vld [vmem:[%s1058_s1 + $0x50] sm:$0xff] (!%p241_p2) }
   0xc   : > { %845 = vmatprep.subr.bf16.mxu0 (!%p241_p2), %v844_v6  ;;  %865 = vmatprep.subr.bf16.mxu1 (!%p241_p2), %v864_v13  ;;  %v852_v19 = vpack.c.bf16 (!%p241_p2), %v295_v16, %v294_v15  ;;  %v856_v22 = vpack.c.bf16 (!%p241_p2), %v297_v21, %v296_v20  ;;  %v299_v24 = vld [vmem:[%s1058_s1 + $0x58] sm:$0xff] (!%p241_p2)  ;;  %v421_v29 = vld [vmem:[%s1060_s3 + $0x20] sm:$0xff] (!%p241_p2)  ;;  %v422_v30 = vld [vmem:[%s1060_s3 + $0x28] sm:$0xff] (!%p241_p2) }
   0xd   : > { %867 = vmatpush3.bf16.msra.mxu1 (!%p241_p2), %v864_v13  ;;  %v860_v25 = vpack.c.bf16 (!%p241_p2), %v299_v24, %v298_v23  ;;  %v872_v31 = vpack.c.bf16 (!%p241_p2), %v422_v30, %v421_v29  ;;  %v423_v32 = vld [vmem:[%s1060_s3 + $0x30] sm:$0xff] (!%p241_p2)  ;;  %v424_v33 = vld [vmem:[%s1060_s3 + $0x38] sm:$0xff] (!%p241_p2)  ;;  %v542_v35 = vld [vmem:[%s1062_s5] sm:$0xff] (!%p241_p2) }
   0xe   : > { %869 = vmatprep.subr.bf16.mxu1 (!%p241_p2), %v868_v17  ;;  %v876_v34 = vpack.c.bf16 (!%p241_p2), %v424_v33, %v423_v32  ;;  %v543_v36 = vld [vmem:[%s1062_s5 + $0x8] sm:$0xff] (!%p241_p2)  ;;  %v721_v38 = vld [vmem:[%s1059_s2] ss:$0 sm:$0xff] (!%p241_p2)  ;;  %v544_v55 = vld [vmem:[%s1062_s5 + $0x10] sm:$0xff] (!%p241_p2) }
   0xf   : > { %s1066_s10 = smov (!%p273_p3, %s717_s10), 7  ;;  %847 = vmatpush3.bf16.msra.mxu0 %v844_v6  ;;  %v880_v37 = vpack.c.bf16 %v543_v36, %v542_v35  ;;  %v545_v56 = vld [vmem:[%s1062_s5 + $0x18] sm:$0xff]  ;;  %v726_v58 = vld [vmem:[%s1061_s4] ss:$0 sm:$0xff] }
  0x10   : > { %s718_s23 = sshll.u32 %s1066_s10, 3  ;;  %849 = vmatprep.subr.bf16.mxu0 %v848_v12  ;;  %v884_v57 = vpack.c.bf16 %v545_v56, %v544_v55  ;;  %v731_v11 = vld [vmem:[#allocation2] ss:$0 sm:$0xff] }
  0x11   : > { %s276_s9 = scalar_lea.vmem %s1057_s0, %s718_s23  ;;  %871 = vmatpush3.bf16.msra.mxu1 %v868_v17  ;;  %s282_s20 = scalar_lea.vmem %s1064_s7, %s718_s23 }
  0x12   : > { %v284_v18 = vld [vmem:[%s276_s9] sm:$0xff]  ;;  %v285_v26 = vld [vmem:[%s276_s9 + $0x8] sm:$0xff]  ;;  %v286_v27 = vld [vmem:[%s276_s9 + $0x10] sm:$0xff]  ;;  %873 = vmatprep.subr.bf16.mxu1 %v872_v31 }
  0x13   : > { %798 = vmatprep.mubr.msk.f32.mxu0 %vm307_vm0, %v284_v18  ;;  %851 = vmatpush3.bf16.msra.mxu0 %v848_v12  ;;  %v287_v28 = vld [vmem:[%s276_s9 + $0x18] sm:$0xff] }
  0x14   : > { %853 = vmatprep.subr.bf16.mxu0 %v852_v19 }
  0x15   : > { %875 = vmatpush3.bf16.msra.mxu1 %v872_v31 }
  0x16   : > { %877 = vmatprep.subr.bf16.mxu1 %v876_v34 }
  0x17   : > { %855 = vmatpush3.bf16.msra.mxu0 %v852_v19 }
  0x18   : > { %857 = vmatprep.subr.bf16.mxu0 %v856_v22 }
  0x19   : > { %879 = vmatpush3.bf16.msra.mxu1 %v876_v34 }
  0x1a   : > { %881 = vmatprep.subr.bf16.mxu1 %v880_v37 }
  0x1b   : > { %859 = vmatpush3.bf16.msra.mxu0 %v856_v22 }
  0x1c   : > { %861 = vmatprep.subr.bf16.mxu0 %v860_v25 }
  0x1f   : > { %863 = vmatpush3.bf16.msra.mxu0 %v860_v25 }
  0x22   : > { %799 = vmatmul.mubr.msk.f32.vlgmr.msra.gmra.mrb[0].mxu0 %vm307_vm0, %v285_v26 }
  0x23   : > { %801 = vmatprep.mubr.msk.f32.mxu0 %vm307_vm0, %v286_v27 }
  0x26   : > { %802 = vmatmul.mubr.msk.f32.gmra.mrb[2].mxu0 %vm307_vm0, %v287_v28 }
  0xf5   : > { %v800_v39 = vpop.f32.mrb[0].mxu0 }
  0xf6   : > { %v392_v40 = vadd.f32 %v800_v39, %v721_v38  ;;  %v386_v41 = vpop.f32.mrb[1].mxu0 }
  0xf7   : > { %v387_v42 = vadd.f32 %v721_v38, %v386_v41 }
  0xf8   : > { %v410_v43 = vmul.f32 0.2, %v392_v40  ;;  %vm406_vm1 = vcmp.gt.f32.partialorder %v392_v40, 0.0 }
  0xf9   : > { %v803_v44 = vpop.f32.mrb[2].mxu0  ;;  %vm405_vm2 = vcmp.gt.f32.partialorder %v387_v42, 0.0  ;;  %v409_v45 = vmul.f32 0.2, %v387_v42 }
  0xfa   : > { %v402_v46 = vadd.f32 %v803_v44, %v721_v38  ;;  %v396_v47 = vpop.f32.mrb[3].mxu0  ;;  %v414_v51 = vsel %vm406_vm1, %v392_v40, %v410_v43 }
  0xfb   : > { %v397_v48 = vadd.f32 %v721_v38, %v396_v47  ;;  %v413_v49 = vsel %vm405_vm2, %v387_v42, %v409_v45 }
  0xfc   : > { %v412_v50 = vmul.f32 0.2, %v402_v46  ;;  %820 = vmatprep.mubr.msk.f32.mxu1 %vm432_vm3, %v413_v49  ;;  %vm408_vm4 = vcmp.gt.f32.partialorder %v402_v46, 0.0 }
  0xfd   : > { %vm407_vm5 = vcmp.gt.f32.partialorder %v397_v48, 0.0  ;;  %v411_v52 = vmul.f32 0.2, %v397_v48  ;;  %821 = vmatmul.mubr.msk.f32.vlgmr.msra.gmra.mrb[0].mxu1 %vm432_vm3, %v414_v51 }
  0xfe   : > { %883 = vmatpush3.bf16.msra.mxu1 %v880_v37  ;;  %v416_v54 = vsel %vm408_vm4, %v402_v46, %v412_v50 }
  0xff   : > { %v415_v53 = vsel %vm407_vm5, %v397_v48, %v411_v52  ;;  %885 = vmatprep.subr.bf16.mxu1 %v884_v57 }
 0x100   : > { %823 = vmatprep.mubr.msk.f32.mxu1 %vm432_vm3, %v415_v53 }
 0x101   : > { %824 = vmatmul.mubr.msk.f32.gmra.mrb[2].mxu1 %vm432_vm3, %v416_v54 }
 0x102   : > { %887 = vmatpush3.bf16.msra.mxu1 %v884_v57 }
 0x1d0   : > { %v822_v59 = vpop.f32.mrb[0].mxu1 }
 0x1d1   : > { %v517_v60 = vadd.f32 %v822_v59, %v726_v58  ;;  %v511_v61 = vpop.f32.mrb[1].mxu1 }
 0x1d2   : > { %v512_v62 = vadd.f32 %v726_v58, %v511_v61 }
 0x1d3   : > { %v535_v63 = vmul.f32 0.2, %v517_v60  ;;  %vm531_vm6 = vcmp.gt.f32.partialorder %v517_v60, 0.0 }
 0x1d4   : > { %vm530_vm7 = vcmp.gt.f32.partialorder %v512_v62, 0.0  ;;  %v534_v0 = vmul.f32 0.2, %v512_v62  ;;  %v825_v1 = vpop.f32.mrb[2].mxu1 }
 0x1d5   : > { %v527_v2 = vadd.f32 %v825_v1, %v726_v58  ;;  %v521_v3 = vpop.f32.mrb[3].mxu1  ;;  %v539_v6 = vsel %vm531_vm6, %v517_v60, %v535_v63 }
 0x1d6   : > { %v522_v4 = vadd.f32 %v726_v58, %v521_v3  ;;  %v538_v5 = vsel %vm530_vm7, %v512_v62, %v534_v0 }
 0x1d7   : > { %v537_v7 = vmul.f32 0.2, %v527_v2  ;;  %834 = vmatprep.mubr.msk.f32.mxu1 %vm553_vm8, %v538_v5  ;;  %vm533_vm9 = vcmp.gt.f32.partialorder %v527_v2, 0.0 }
 0x1d8   : > { %vm532_vm10 = vcmp.gt.f32.partialorder %v522_v4, 0.0  ;;  %v536_v8 = vmul.f32 0.2, %v522_v4  ;;  %835 = vmatmul.mubr.msk.f32.vlgmr.msra.gmra.mrb[4].mxu1 %vm553_vm8, %v539_v6 }
 0x1d9   : > { %v541_v10 = vsel %vm533_vm9, %v527_v2, %v537_v7 }
 0x1da   : > { %v540_v9 = vsel %vm532_vm10, %v522_v4, %v536_v8 }
 0x1db   : > { %837 = vmatprep.mubr.msk.f32.mxu1 %vm553_vm8, %v540_v9 }
 0x1dc   : > { %838 = vmatmul.mubr.msk.f32.gmra.mrb[6].mxu1 %vm553_vm8, %v541_v10 }
 0x2ab   : > { %v836_v12 = vpop.f32.mrb[4].mxu1 }
 0x2ac   : > { %v632_v13 = vpop.f32.mrb[5].mxu1  ;;  %v638_v15 = vadd.f32 %v836_v12, %v731_v11 }
 0x2ad   : > { %v633_v14 = vadd.f32 %v731_v11, %v632_v13 }
 0x2ae   : > { %653 = vst.msk [vmem:[%s282_s20 + $0x8] sm:$0xff] %vm651_vm11, %v638_v15 }
 0x2af   : > { %652 = vst.msk [vmem:[%s282_s20] sm:$0xff] %vm651_vm11, %v633_v14  ;;  %v839_v16 = vpop.f32.mrb[6].mxu1 }
 0x2b0   : > { %v642_v17 = vpop.f32.mrb[7].mxu1  ;;  %v648_v19 = vadd.f32 %v839_v16, %v731_v11 }
 0x2b1   : > { %v643_v18 = vadd.f32 %v731_v11, %v642_v17 }
 0x2b2   : > { %655 = vst.msk [vmem:[%s282_s20 + $0x18] sm:$0xff] %vm651_vm11, %v648_v19 }
 0x2b3   : > { %654 = vst.msk [vmem:[%s282_s20 + $0x10] sm:$0xff] %vm651_vm11, %v643_v18 }
 0x2b4 PF: > { %s19_s26 = sadd.s32 1, %s902_s26  }
 0x2b5   : > { %p16_p4 = scmp.ge.s32.totalorder %s19_s26, 4  }
 0x2b7   :  { %18 = sbr.rel (!%p16_p4) target bundleno = 3 (0x3), region = 78 }

</bundles_post_ra>
